<compile_context>
chip_gen: v7x
topology: tpu7x:2x2x1
jax: 0.10.0
libtpu: 0.0.40
codegen_flags: <defaults>
</compile_context>

<pallas_src>
import functools

import jax
import jax.numpy as jnp
from jax.experimental import pallas as pl
from jax.experimental.pallas import tpu as pltpu

_LANE = 128
_SUBLANE = 8
_BIG = 1.0e30              # softmax-axis padding sentinel (exp underflows to exactly 0)
_BUF_BUDGET = 32 << 20     # bytes for the 2 inputs x 2 pipeline buffers
_VMEM_LIMIT = 48 << 20     # scoped VMEM limit: safe on v5e/v6e (128 MiB) and v7x (64 MiB)


def _round_up(x, m):
    return ((x + m - 1) // m) * m


def _default_ncores():
    # Only v7x has 2 TensorCores per chip worth sharding the grid across.
    try:
        kind = jax.devices()[0].device_kind.lower()
    except Exception:
        return 1
    return 2 if ("v7" in kind or "7x" in kind) else 1


def _list_one_kernel(p_ref, t_ref, out_ref, *,
                     softmax_axis, inv_m, eps, n_valid, batch_block, batch_total):
    """One grid step = one batch block.  softmax_axis: 1 (lane) or 0 (sublane)."""
    c = pl.program_id(0)          # per-core partial sum         ("parallel")
    i = pl.program_id(1)          # batch-block index            ("arbitrary")

    @pl.when(i == 0)
    def _():
        out_ref[...] = jnp.zeros_like(out_ref)

    # Fold the 1/M scale, the y_true negation and the f32 upcast into the kernel.
    zp = p_ref[...].astype(jnp.float32) * inv_m
    zt = t_ref[...].astype(jnp.float32) * (-inv_m)

    ax = softmax_axis

    # log(softmax(zp) + eps) = log(pe + eps*Zp) - log(Zp): per-element divide hoisted.
    pm = jnp.max(zp, axis=ax, keepdims=True)
    pe = jnp.exp(zp - pm)                       # padded softmax entries -> exactly 0
    zp_sum = jnp.sum(pe, axis=ax, keepdims=True)
    pred_log = jnp.log(pe + eps * zp_sum) - jnp.log(zp_sum)

    # softmax(zt): defer the 1/Zt normalization to one divide per list.
    tm = jnp.max(zt, axis=ax, keepdims=True)
    te = jnp.exp(zt - tm)                       # padded softmax entries -> exactly 0
    zt_sum = jnp.sum(te, axis=ax, keepdims=True)

    per_list = jnp.sum(te * pred_log, axis=ax, keepdims=True) / zt_sum

    if n_valid < batch_total:                   # mask batch padding (trace-time check)
        batch_ax = 1 - ax
        first = (c * pl.num_programs(1) + i) * batch_block
        lid = first + jax.lax.broadcasted_iota(jnp.int32, per_list.shape, batch_ax)
        per_list = jnp.where(lid < n_valid, per_list, 0.0)

    # Accumulate a single scalar into the resident output block (one vreg RMW per step).
    out_ref[...] += jnp.sum(per_list)

    @pl.when(i == pl.num_programs(1) - 1)
    def _():
        out_ref[...] = -out_ref[...]


def list_one_loss(y_pred, y_true, *, M=1.0, eps=1e-9, ncores=None):
    """Pallas-backed ListOneLoss forward.  y_pred, y_true: [S, B]; softmax over dim 0."""
    assert y_pred.shape == y_true.shape and y_pred.ndim == 2
    assert M > 0, "M must be positive"
    S, B = y_pred.shape
    if ncores is None:
        ncores = _default_ncores()

    itemsize = max(jnp.dtype(y_pred.dtype).itemsize, jnp.dtype(y_true.dtype).itemsize)
    per_core = pl.cdiv(B, ncores)
    use_sublane = S <= 64          # short slate: keep [S, B], softmax on sublanes

    if use_sublane:
        s_pad = _round_up(S, _SUBLANE)
        cap = max(_LANE, (_BUF_BUDGET // (4 * itemsize * s_pad)) // _LANE * _LANE)
        tbatch = max(_LANE, min(4096, cap, _round_up(per_core, _LANE)))
        blocks_per_core = pl.cdiv(per_core, tbatch)
        b_pad = ncores * blocks_per_core * tbatch
        # Pad the softmax (sublane) axis with +/-BIG, the batch (lane) axis with 0.
        yp = jnp.pad(y_pred, ((0, s_pad - S), (0, 0)), constant_values=-_BIG)
        yt = jnp.pad(y_true, ((0, s_pad - S), (0, 0)), constant_values=_BIG)
        yp = jnp.pad(yp, ((0, 0), (0, b_pad - B)))
        yt = jnp.pad(yt, ((0, 0), (0, b_pad - B)))
        block = (s_pad, tbatch)
        softmax_axis = 0

        def index_map(c, i):
            return (0, c * blocks_per_core + i)
    else:
        s_pad = _round_up(S, _LANE)
        cap = max(_SUBLANE, (_BUF_BUDGET // (4 * itemsize * s_pad)) // _SUBLANE * _SUBLANE)
        tbatch = max(_SUBLANE, min(1024, cap, _round_up(per_core, _SUBLANE)))
        blocks_per_core = pl.cdiv(per_core, tbatch)
        b_pad = ncores * blocks_per_core * tbatch
        # [B, S]: softmax axis on lanes.
        yp = jnp.pad(y_pred.T, ((0, 0), (0, s_pad - S)), constant_values=-_BIG)
        yt = jnp.pad(y_true.T, ((0, 0), (0, s_pad - S)), constant_values=_BIG)
        yp = jnp.pad(yp, ((0, b_pad - B), (0, 0)))
        yt = jnp.pad(yt, ((0, b_pad - B), (0, 0)))
        block = (tbatch, s_pad)
        softmax_axis = 1

        def index_map(c, i):
            return (c * blocks_per_core + i, 0)

    kernel = functools.partial(
        _list_one_kernel,
        softmax_axis=softmax_axis, inv_m=float(1.0 / M), eps=float(eps),
        n_valid=B, batch_block=tbatch, batch_total=b_pad)

    spec = pl.BlockSpec(block, index_map)
    partials = pl.pallas_call(
        kernel,
        out_shape=jax.ShapeDtypeStruct((ncores, 8, 128), jnp.float32),
        grid_spec=pltpu.PrefetchScalarGridSpec(
            num_scalar_prefetch=0,
            grid=(ncores, blocks_per_core),
            in_specs=[spec, spec],
            out_specs=pl.BlockSpec((1, 8, 128), lambda c, i: (c, 0, 0)),
        ),
        compiler_params=pltpu.CompilerParams(
            dimension_semantics=("parallel", "arbitrary"),
            vmem_limit_bytes=_VMEM_LIMIT),
    )(yp, yt)

    return jnp.sum(partials[:, 0, 0])


def _list_one_ref(y_pred, y_true, M=1.0):
    """Pure-JAX reference mirroring the PyTorch ListOneLoss forward."""
    pred_max = jax.nn.softmax(y_pred / M, axis=0) + 1e-9
    true_max = jax.nn.softmax(-y_true / M, axis=0)
    pred_log = jnp.log(pred_max)
    return jnp.mean(-jnp.sum(true_max * pred_log))


if __name__ == "__main__":
    key = jax.random.PRNGKey(0)
    k1, k2, k3, k4 = jax.random.split(key, 4)

    # Small slate (S=16, B=4): exercises the sublane-softmax [S, B] path (no transpose).
    S1, B1 = 16, 4
    yp1 = jax.random.normal(k1, (S1, B1), dtype=jnp.float32)
    yt1 = jax.random.randint(k2, (S1, B1), 0, 5).astype(jnp.float32)
    out1 = jax.block_until_ready(list_one_loss(yp1, yt1, M=1.0))
    ref1 = jax.block_until_ready(_list_one_ref(yp1, yt1, M=1.0))
    assert jnp.allclose(out1, ref1, rtol=1e-5, atol=1e-6), (out1, ref1)

    # Longer slate (S=256, B=8): exercises the lane-softmax (transposed) path.
    S2, B2 = 256, 8
    yp2 = jax.random.normal(k3, (S2, B2), dtype=jnp.float32)
    yt2 = jax.random.randint(k4, (S2, B2), 0, 5).astype(jnp.float32)
    out2 = jax.block_until_ready(list_one_loss(yp2, yt2, M=2.0))
    ref2 = jax.block_until_ready(_list_one_ref(yp2, yt2, M=2.0))
    assert jnp.allclose(out2, ref2, rtol=1e-5, atol=1e-6), (out2, ref2)

    print("KERNEL_OK")
</pallas_src>

<mosaic_0001>
module attributes {stable_mosaic.version = 11 : i64} {
  func.func @_list_one_kernel(%arg0: i32, %arg1: i32, %arg2: memref<16x128xf32, #tpu.memory_space<vmem>>, %arg3: memref<16x128xf32, #tpu.memory_space<vmem>>, %arg4: memref<1x8x128xf32, #tpu.memory_space<vmem>>) attributes {dimension_semantics = [#tpu.dimension_semantics<parallel>, #tpu.dimension_semantics<arbitrary>], iteration_bounds = array<i64: 1, 1>, scalar_prefetch = 0 : i64, scratch_operands = 0 : i64, tpu.core_type = #tpu.core_type<tc>, window_params = [{transform_indices = @transform_0, window_bounds = array<i64: 16, 128>}, {transform_indices = @transform_1, window_bounds = array<i64: 16, 128>}, {transform_indices = @transform_2, window_bounds = array<i64: 1, 8, 128>}]} {
    %c0_i32 = arith.constant 0 : i32
    %0 = arith.cmpi eq, %arg1, %c0_i32 : i32
    %1 = arith.extui %0 : i1 to i32
    %c0_i32_0 = arith.constant 0 : i32
    %2 = arith.cmpi ne, %1, %c0_i32_0 : i32
    scf.if %2 {
      %cst_21 = arith.constant 0.000000e+00 : f32
      %56 = vector.broadcast %cst_21 : f32 to vector<1x8x128xf32>
      %c0_22 = arith.constant 0 : index
      %c0_23 = arith.constant 0 : index
      %c0_24 = arith.constant 0 : index
      %57 = vector.load %arg4[%c0_22, %c0_23, %c0_24] : memref<1x8x128xf32, #tpu.memory_space<vmem>>, vector<1x8x128xf32>
      tpu.vector_store %arg4[%c0_22, %c0_23, %c0_24], %56 {strides = array<i32>} : memref<1x8x128xf32, #tpu.memory_space<vmem>>, vector<1x8x128xf32>,
    } else {
    }
    %c0 = arith.constant 0 : index
    %c0_1 = arith.constant 0 : index
    %3 = vector.load %arg2[%c0, %c0_1] : memref<16x128xf32, #tpu.memory_space<vmem>>, vector<16x128xf32>
    %cst = arith.constant 1.000000e+00 : f32
    %4 = vector.broadcast %cst : f32 to vector<16x128xf32>
    %5 = arith.mulf %3, %4 : vector<16x128xf32>
    %c0_2 = arith.constant 0 : index
    %c0_3 = arith.constant 0 : index
    %6 = vector.load %arg3[%c0_2, %c0_3] : memref<16x128xf32, #tpu.memory_space<vmem>>, vector<16x128xf32>
    %cst_4 = arith.constant -1.000000e+00 : f32
    %7 = vector.broadcast %cst_4 : f32 to vector<16x128xf32>
    %8 = arith.mulf %6, %7 : vector<16x128xf32>
    %cst_5 = arith.constant dense<0xFF800000> : vector<128xf32>
    %9 = vector.multi_reduction <maximumf>, %5, %cst_5 [0] : vector<16x128xf32> to vector<128xf32>
    %10 = vector.shape_cast %9 : vector<128xf32> to vector<1x128xf32>
    %11 = vector.broadcast %10 : vector<1x128xf32> to vector<16x128xf32>
    %12 = arith.subf %5, %11 : vector<16x128xf32>
    %13 = math.exp %12 : vector<16x128xf32>
    %cst_6 = arith.constant dense<0.000000e+00> : vector<128xf32>
    %14 = vector.multi_reduction <add>, %13, %cst_6 [0] : vector<16x128xf32> to vector<128xf32>
    %15 = vector.shape_cast %14 : vector<128xf32> to vector<1x128xf32>
    %cst_7 = arith.constant 9.99999971E-10 : f32
    %16 = vector.broadcast %cst_7 : f32 to vector<1x128xf32>
    %17 = arith.mulf %16, %15 : vector<1x128xf32>
    %18 = vector.broadcast %17 : vector<1x128xf32> to vector<16x128xf32>
    %19 = arith.addf %13, %18 : vector<16x128xf32>
    %20 = math.log %19 : vector<16x128xf32>
    %21 = math.log %15 : vector<1x128xf32>
    %22 = vector.broadcast %21 : vector<1x128xf32> to vector<16x128xf32>
    %23 = arith.subf %20, %22 : vector<16x128xf32>
    %cst_8 = arith.constant dense<0xFF800000> : vector<128xf32>
    %24 = vector.multi_reduction <maximumf>, %8, %cst_8 [0] : vector<16x128xf32> to vector<128xf32>
    %25 = vector.shape_cast %24 : vector<128xf32> to vector<1x128xf32>
    %26 = vector.broadcast %25 : vector<1x128xf32> to vector<16x128xf32>
    %27 = arith.subf %8, %26 : vector<16x128xf32>
    %28 = math.exp %27 : vector<16x128xf32>
    %cst_9 = arith.constant dense<0.000000e+00> : vector<128xf32>
    %29 = vector.multi_reduction <add>, %28, %cst_9 [0] : vector<16x128xf32> to vector<128xf32>
    %30 = vector.shape_cast %29 : vector<128xf32> to vector<1x128xf32>
    %31 = arith.mulf %28, %23 : vector<16x128xf32>
    %cst_10 = arith.constant dense<0.000000e+00> : vector<128xf32>
    %32 = vector.multi_reduction <add>, %31, %cst_10 [0] : vector<16x128xf32> to vector<128xf32>
    %33 = vector.shape_cast %32 : vector<128xf32> to vector<1x128xf32>
    %34 = arith.divf %33, %30 : vector<1x128xf32>
    %c1_i32 = arith.constant 1 : i32
    %35 = arith.muli %arg0, %c1_i32 : i32
    %36 = arith.addi %35, %arg1 : i32
    %c128_i32 = arith.constant 128 : i32
    %37 = arith.muli %36, %c128_i32 : i32
    %38 = tpu.iota {dimensions = array<i32: 1>} : vector<1x128xi32>
    %39 = vector.broadcast %37 : i32 to vector<1x128xi32>
    %40 = arith.addi %39, %38 : vector<1x128xi32>
    %c4_i32 = arith.constant 4 : i32
    %41 = vector.broadcast %c4_i32 : i32 to vector<1x128xi32>
    %42 = arith.cmpi slt, %40, %41 : vector<1x128xi32>
    %cst_11 = arith.constant 0.000000e+00 : f32
    %43 = vector.broadcast %cst_11 : f32 to vector<1x128xf32>
    %44 = arith.select %42, %34, %43 : vector<1x128xi1>, vector<1x128xf32>
    %c0_12 = arith.constant 0 : index
    %c0_13 = arith.constant 0 : index
    %c0_14 = arith.constant 0 : index
    %45 = vector.load %arg4[%c0_12, %c0_13, %c0_14] : memref<1x8x128xf32, #tpu.memory_space<vmem>>, vector<1x8x128xf32>
    %46 = vector.shape_cast %44 : vector<1x128xf32> to vector<1x1x128xf32>
    %cst_15 = arith.constant dense<0.000000e+00> : vector<1xf32>
    %47 = vector.multi_reduction <add>, %46, %cst_15 [1, 2] : vector<1x1x128xf32> to vector<1xf32>
    %48 = vector.shape_cast %47 : vector<1xf32> to vector<1x1x1xf32>
    %49 = vector.extract %48[0, 0, 0] : f32 from vector<1x1x1xf32>
    %50 = vector.broadcast %49 : f32 to vector<1x8x128xf32>
    %51 = arith.addf %45, %50 : vector<1x8x128xf32>
    %c0_16 = arith.constant 0 : index
    %c0_17 = arith.constant 0 : index
    %c0_18 = arith.constant 0 : index
    %52 = vector.load %arg4[%c0_16, %c0_17, %c0_18] : memref<1x8x128xf32, #tpu.memory_space<vmem>>, vector<1x8x128xf32>
    tpu.vector_store %arg4[%c0_16, %c0_17, %c0_18], %51 {strides = array<i32>} : memref<1x8x128xf32, #tpu.memory_space<vmem>>, vector<1x8x128xf32>,
    %c0_i32_19 = arith.constant 0 : i32
    %53 = arith.cmpi eq, %arg1, %c0_i32_19 : i32
    %54 = arith.extui %53 : i1 to i32
    %c0_i32_20 = arith.constant 0 : i32
    %55 = arith.cmpi ne, %54, %c0_i32_20 : i32
    scf.if %55 {
      %c0_21 = arith.constant 0 : index
      %c0_22 = arith.constant 0 : index
      %c0_23 = arith.constant 0 : index
      %56 = vector.load %arg4[%c0_21, %c0_22, %c0_23] : memref<1x8x128xf32, #tpu.memory_space<vmem>>, vector<1x8x128xf32>
      %cst_24 = arith.constant 0.000000e+00 : f32
      %57 = vector.broadcast %cst_24 : f32 to vector<1x8x128xf32>
      %58 = arith.subf %57, %56 : vector<1x8x128xf32>
      %c0_25 = arith.constant 0 : index
      %c0_26 = arith.constant 0 : index
      %c0_27 = arith.constant 0 : index
      %59 = vector.load %arg4[%c0_25, %c0_26, %c0_27] : memref<1x8x128xf32, #tpu.memory_space<vmem>>, vector<1x8x128xf32>
      tpu.vector_store %arg4[%c0_25, %c0_26, %c0_27], %58 {strides = array<i32>} : memref<1x8x128xf32, #tpu.memory_space<vmem>>, vector<1x8x128xf32>,
    } else {
    }
    return
  }
  func.func @transform_0(%arg0: i32, %arg1: i32) -> (i32, i32) {
    %c1_i32 = arith.constant 1 : i32
    %0 = arith.muli %arg0, %c1_i32 : i32
    %1 = arith.addi %0, %arg1 : i32
    %c0_i32 = arith.constant 0 : i32
    %c0_i32_0 = arith.constant 0 : i32
    return %c0_i32, %1 : i32, i32
  }
  func.func @transform_1(%arg0: i32, %arg1: i32) -> (i32, i32) {
    %c1_i32 = arith.constant 1 : i32
    %0 = arith.muli %arg0, %c1_i32 : i32
    %1 = arith.addi %0, %arg1 : i32
    %c0_i32 = arith.constant 0 : i32
    %c0_i32_0 = arith.constant 0 : i32
    return %c0_i32, %1 : i32, i32
  }
  func.func @transform_2(%arg0: i32, %arg1: i32) -> (i32, i32, i32) {
    %c0_i32 = arith.constant 0 : i32
    %c0_i32_0 = arith.constant 0 : i32
    %c0_i32_1 = arith.constant 0 : i32
    return %arg0, %c0_i32, %c0_i32_0 : i32, i32, i32
  }
}

</mosaic_0001>

<bundles_post_ra>
// kernel: tpu_custom_call.1
= control target key start
LH: loop header
LB: loop body
LE: loop exit
PB: predicated region body
PF: predicated region fallthrough
CT: control target
= control target key end

     0   :  { %7 = vsyncpa [#allocation3], 0  ;;  %s318_s0 = inlined_call_operand.hbm [shape: f32[16,128], index: 0, kind: input, shape index: {}]   ;;  %s319_s1 = inlined_call_operand.hbm [shape: f32[16,128], index: 1, kind: input, shape index: {}]   ;;  %s320_s2 = inlined_call_operand.hbm [shape: f32[1,8,128], index: 2, kind: output, shape index: {}]  }
   0x1   :  { %8 = vsyncpa [#allocation6], 0 }
   0x2   :  { %9 = vsyncpa [#allocation4], 0  ;;  %s262_s9 = smov [#allocation2]   ;;  %s190_s13 = scalar_lea.hbm %s318_s0, 256 }
   0x3   :  { %s18_s10 = sshll.u32 %s262_s9, 4  ;;  %p191_p0 = scmp.ne.s32.totalorder %s318_s0, %s190_s13  ;;  %s19_s10 = int_to_ptr.vmem [resolvable:$true] %s18_s10 }
   0x4   :  { %p194_p1 = scmp.lt.u32.totalorder %s190_s13, %s318_s0 }
   0x6   :  { %p196_p2 = pnand %p194_p1, %p191_p0 }
   0x8   :  { %199 = shalt.err (!%p196_p2)
}
   0x9   :  { %s200_s18 = scalar_lea.vmem %s19_s10, 256  ;;  %p205_p4 = scmp.lt.s32.totalorder %s19_s10, %s19_s10 }
   0xa   :  { %p201_p3 = scmp.ne.s32.totalorder %s19_s10, %s200_s18  ;;  %p206_p5 = scmp.lt.s32.totalorder %s200_s18, %s200_s18 }
   0xc   :  { %p207_p6 = por %p206_p5, %p205_p4 }
   0xe   :  { %p208_p7 = pnand %p207_p6, %p201_p3 }
  0x10   :  { %211 = shalt.err (!%p208_p7)
}
  0x11   :  { %s263_s19 = smov 128   ;;  %s264_s20 = smov 8  }
  0x12   :  { %24 = dma.hbm_to_vmem [thread:$0]  %s318_s0, 256, %s19_s10, [#allocation3], %s263_s19, %s263_s19, %s264_s20  }
  0x13   :  { %s265_s23 = smov [#allocation5]   ;;  %s212_s27 = scalar_lea.hbm %s319_s1, 256 }
  0x14   :  { %s33_s24 = sshll.u32 %s265_s23, 4  ;;  %p213_p8 = scmp.ne.s32.totalorder %s319_s1, %s212_s27  ;;  %s34_s24 = int_to_ptr.vmem [resolvable:$true] %s33_s24 }
  0x15   :  { %p216_p9 = scmp.lt.u32.totalorder %s212_s27, %s319_s1 }
  0x17   :  { %p218_p10 = pnand %p216_p9, %p213_p8 }
  0x19   :  { %221 = shalt.err (!%p218_p10)
}
  0x1a   :  { %s222_s4 = scalar_lea.vmem %s34_s24, 256  ;;  %p227_p12 = scmp.lt.s32.totalorder %s34_s24, %s34_s24 }
  0x1b   :  { %p223_p11 = scmp.ne.s32.totalorder %s34_s24, %s222_s4  ;;  %p228_p13 = scmp.lt.s32.totalorder %s222_s4, %s222_s4 }
  0x1d   :  { %p229_p0 = por %p228_p13, %p227_p12 }
  0x1f   :  { %p230_p1 = pnand %p229_p0, %p223_p11 }
  0x21   :  { %233 = shalt.err (!%p230_p1)
}
  0x22   :  { %39 = dma.hbm_to_vmem [thread:$0]  %s319_s1, 256, %s34_s24, [#allocation6], %s263_s19, %s263_s19, %s264_s20  }
  0x23   :  { %256 = dma.done.wait [#allocation3], 256  }
  0x24   :  { %257 = vsyncadd [#allocation3], 4294967040 }
  0x25   :  { %258 = dma.done.wait [#allocation6], 256  }
  0x26   :  { %259 = vsyncadd [#allocation6], 4294967040  ;;  %v53_v0 = vld [vmem:[#allocation2] sm:$0xff]  ;;  %v54_v1 = vld [vmem:[#allocation2 + $0x8] sm:$0xff]  ;;  %v123_v62 = vlaneseq  ;;  %vm130_vm1 = vcmask 1040384   ;;  %s266_s6 = smov [#allocation7]  }
  0x27   :  { %v55_v2 = vld [vmem:[#allocation5] sm:$0xff]  ;;  %v56_v3 = vld [vmem:[#allocation5 + $0x8] sm:$0xff]  ;;  %v59_v5 = vmax.f32 %v53_v0, %v54_v1  ;;  %s156_s7 = sshll.u32 %s266_s6, 4  ;;  %s157_s7 = int_to_ptr.vmem [resolvable:$true] %s156_s7 }
  0x28   :  { %v57_v4 = vmul.f32 -1.0, %v55_v2  ;;  %v58_v6 = vmul.f32 -1.0, %v56_v3  ;;  %s234_s8 = scalar_lea.vmem %s157_s7, 128  ;;  %p239_p3 = scmp.lt.s32.totalorder %s157_s7, %s157_s7 }
  0x29   :  { %v60_v7 = vrot.slane %v59_v5, 4  ;;  %p235_p2 = scmp.ne.s32.totalorder %s157_s7, %s234_s8  ;;  %p240_p4 = scmp.lt.s32.totalorder %s234_s8, %s234_s8 }
  0x2a   :  { %v90_v8 = vmax.f32 %v57_v4, %v58_v6 }
  0x2b   :  { %v61_v9 = vmax.f32 %v59_v5, %v60_v7  ;;  %p241_p5 = por %p240_p4, %p239_p3 }
  0x2c   :  { %v91_v10 = vrot.slane %v90_v8, 4 }
  0x2d   :  { %v62_v11 = vrot.slane %v61_v9, 2  ;;  %p242_p6 = pnand %p241_p5, %p235_p2 }
  0x2e   :  { %v92_v12 = vmax.f32 %v90_v8, %v91_v10 }
  0x2f   :  { %v63_v13 = vmax.f32 %v61_v9, %v62_v11 }
  0x30   :  { %v93_v14 = vrot.slane %v92_v12, 2 }
  0x31   :  { %v64_v15 = vrot.slane %v63_v13, 1 }
  0x32   :  { %v94_v16 = vmax.f32 %v92_v12, %v93_v14 }
  0x33   :  { %v65_v17 = vmax.f32 %v63_v13, %v64_v15 }
  0x34   :  { %v95_v18 = vrot.slane %v94_v16, 1 }
  0x35   :  { %v66_v19 = vsub.f32 %v53_v0, %v65_v17  ;;  %v67_v20 = vsub.f32 %v54_v1, %v65_v17  ;;  %v124_v1 = vand.u32 127, %v123_v62 }
  0x36   :  { %v96_v21 = vmax.f32 %v94_v16, %v95_v18 }
  0x37   :  { %v68_v22 = vmul.f32 1.442695, %v66_v19  ;;  %v70_v23 = vmul.f32 1.442695, %v67_v20  ;;  %vm127_vm0 = vcmp.lt.s32.totalorder %v124_v1, 4 }
  0x38   :  { %v97_v24 = vsub.f32 %v57_v4, %v96_v21  ;;  %v98_v25 = vsub.f32 %v58_v6, %v96_v21 }
  0x39   :  { %174 = vpow2.f32 %v68_v22 }
  0x3a   :  { %176 = vpow2.f32 %v70_v23  ;;  %v99_v26 = vmul.f32 1.442695, %v97_v24  ;;  %v101_v27 = vmul.f32 1.442695, %v98_v25 }
  0x3c   :  { %178 = vpow2.f32 %v99_v26 }
  0x3d   :  { %180 = vpow2.f32 %v101_v27 }
  0x43   :  { %v175_v28 = vpop.eup %174 }
  0x44   :  { %v177_v29 = vpop.eup %176 }
  0x45   :  { %v72_v30 = vadd.f32 %v177_v29, %v175_v28 }
  0x46   :  { %v179_v33 = vpop.eup %178 }
  0x47   :  { %v73_v31 = vrot.slane %v72_v30, 4  ;;  %v181_v34 = vpop.eup %180 }
  0x48   :  { %v103_v37 = vadd.f32 %v181_v34, %v179_v33 }
  0x49   :  { %v74_v32 = vadd.f32 %v73_v31, %v72_v30 }
  0x4a   :  { %v104_v40 = vrot.slane %v103_v37, 4 }
  0x4b   :  { %v75_v35 = vrot.slane %v74_v32, 2 }
  0x4c   :  { %v105_v44 = vadd.f32 %v104_v40, %v103_v37 }
  0x4d   :  { %v76_v36 = vadd.f32 %v75_v35, %v74_v32 }
  0x4e   :  { %v106_v45 = vrot.slane %v105_v44, 2 }
  0x4f   :  { %v77_v38 = vrot.slane %v76_v36, 1 }
  0x50   :  { %v107_v47 = vadd.f32 %v106_v45, %v105_v44 }
  0x51   :  { %v78_v39 = vadd.f32 %v77_v38, %v76_v36 }
  0x52   :  { %v108_v52 = vrot.slane %v107_v47, 1 }
  0x53   :  { %v79_v41 = vmul.f32 1e-09, %v78_v39  ;;  %182 = vlog2.f32 %v78_v39 }
  0x54   :  { %v109_v56 = vadd.f32 %v108_v52, %v107_v47 }
  0x55   :  { %v80_v42 = vadd.f32 %v175_v28, %v79_v41  ;;  %v81_v43 = vadd.f32 %v177_v29, %v79_v41 }
  0x57   :  { %184 = vlog2.f32 %v80_v42 }
  0x58   :  { %186 = vlog2.f32 %v81_v43 }
  0x59   :  { %188 = vrcp.f32 %v109_v56 }
  0x5d   :  { %v183_v46 = vpop.eup %182 }
  0x5e   :  { %v87_v48 = vmul.f32 0.6931472, %v183_v46 }
  0x61   :  { %v185_v49 = vpop.eup %184 }
  0x62   :  { %v187_v50 = vpop.eup %186  ;;  %v83_v51 = vmul.f32 0.6931472, %v185_v49 }
  0x63   :  { %v85_v53 = vmul.f32 0.6931472, %v187_v50  ;;  %v189_v3 = vpop.eup %188 }
  0x64   :  { %v88_v54 = vsub.f32 %v83_v51, %v87_v48 }
  0x65   :  { %v89_v55 = vsub.f32 %v85_v53, %v87_v48 }
  0x66   :  { %v110_v57 = vmul.f32 %v179_v33, %v88_v54 }
  0x67   :  { %v111_v58 = vmul.f32 %v181_v34, %v89_v55 }
  0x69   :  { %v112_v59 = vadd.f32 %v111_v58, %v110_v57 }
  0x6b   :  { %v113_v60 = vrot.slane %v112_v59, 4 }
  0x6d   :  { %v114_v61 = vadd.f32 %v113_v60, %v112_v59 }
  0x6f   :  { %v115_v63 = vrot.slane %v114_v61, 2 }
  0x71   :  { %v116_v0 = vadd.f32 %v115_v63, %v114_v61 }
  0x73   :  { %v117_v2 = vrot.slane %v116_v0, 1 }
  0x75   :  { %v118_v4 = vadd.f32 %v117_v2, %v116_v0 }
  0x77   :  { %v120_v5 = vmul.f32 %v189_v3, %v118_v4 }
  0x79   :  { %v128_v6 = vsel %vm127_vm0, %v120_v5, 0.0 }
  0x7a   :  { %v131_v7 = vsel %vm130_vm1, %v128_v6, 0.0 }
  0x7b   :  { %132 = vadd.xlane.f32.xlu0 %v131_v7 }
 0x108   :  { %v133_v8 = vpop.xlane.xlu0 %132 }
 0x109   :  { %v134_v9 = vrot.slane %v133_v8, 4 }
 0x10b   :  { %v135_v10 = vadd.f32 %v134_v9, %v133_v8 }
 0x10d   :  { %v136_v11 = vrot.slane %v135_v10, 2 }
 0x10f   :  { %v137_v12 = vadd.f32 %v136_v11, %v135_v10 }
 0x111   :  { %v138_v13 = vrot.slane %v137_v12, 1 }
 0x113   :  { %v139_v14 = vadd.f32 %v138_v13, %v137_v12 }
 0x115   :  { %166 = vpush %v139_v14 }
 0x146   :  { %s167_s1 = spop %166 }
 0x147   :  { %v141_v15 = vstv %s167_s1 }
 0x148   :  { %v148_v16 = vsub.f32 0.0, %v141_v15 }
 0x14a   :  { %149 = vst [vmem:[#allocation7] sm:$0xff] %v148_v16 }
 0x14b   :  { %245 = shalt.err (!%p242_p6)
}
 0x14c   :  { %s246_s11 = scalar_lea.hbm %s320_s2, 128 }
 0x14d   :  { %p247_p7 = scmp.ne.s32.totalorder %s320_s2, %s246_s11  ;;  %p250_p8 = scmp.lt.u32.totalorder %s246_s11, %s320_s2 }
 0x14f   :  { %p252_p9 = pnand %p250_p8, %p247_p7 }
 0x151   :  { %255 = shalt.err (!%p252_p9)
}
 0x152   :  { %159 = dma.vmem_to_hbm [thread:$0]  %s157_s7, 128, %s320_s2, [#allocation4]  }
 0x153   :  { %260 = dma.done.wait [#allocation4], 128  }
 0x154   :  { %261 = vsyncadd [#allocation4], 4294967168 }
 0x155   :  { %163 = vsyncpa [#allocation3], 1 }
 0x156   :  { %164 = vsyncpa [#allocation6], 1 }
 0x157   :  { %165 = vsyncpa [#allocation4], 1 }

</bundles_post_ra>
